<compile_context>
chip_gen: v6e
topology: v6e:2x2x1
jax: 0.10.0
libtpu: 0.0.40
codegen_flags: <defaults>
</compile_context>

<pallas_src>
import math
from functools import partial

import jax
import jax.numpy as jnp
from jax import lax
from jax.experimental import pallas as pl
from jax.experimental.pallas import tpu as pltpu

BN_EPS = 1e-5


def _pick_k_tile(k0):
    """K-tile for layer 0 so its weight DMA pipelines against the matmul."""
    for t in (256, 512, 128):
        if k0 % t == 0 and k0 // t > 1:
            return t
    return k0  # fall back to a single grid step


def _fused_mlp_kernel(*refs, true_b):
    """refs = (x, w0, gb0, w1, gb1, ..., o, acc).

    Grid axis 0 splits layer-0's K: each step accumulates a partial
    x_tile @ w0_tile into the f32 scratch accumulator.  On the last step the
    BN+ReLU for layer 0 and the (tiny) remaining layers run from VMEM.
    w_l: bf16 (Fin_l, Fout_l) pre-transposed; gb_l: f32 (2, Fout_l) = [gamma;beta].
    """
    x_ref = refs[0]
    o_ref = refs[-2]
    acc_ref = refs[-1]
    layer_refs = refs[1:-2]
    n_layers = len(layer_refs) // 2

    k = pl.program_id(0)

    @pl.when(k == 0)
    def _init():
        acc_ref[...] = jnp.zeros_like(acc_ref)

    # Layer-0 partial matmul on this K slice (bf16 x bf16 -> f32 on the MXU).
    acc_ref[...] += jnp.dot(x_ref[...], layer_refs[0][...],
                            preferred_element_type=jnp.float32)

    @pl.when(k == pl.num_programs(0) - 1)
    def _finalize():
        b_pad = acc_ref.shape[0]
        inv_b = 1.0 / float(true_b)
        # Rows >= true_b are zero padding: exclude them from BN statistics
        # and keep them zeroed so they never feed the next layer.
        row_ids = lax.broadcasted_iota(jnp.int32, (b_pad, 1), 0)
        row_mask = (row_ids < true_b).astype(jnp.float32)

        def bn_relu(h, gb):
            # BatchNorm1d, training mode: batch mean, biased variance (÷ true B).
            mean = jnp.sum(h, axis=0, keepdims=True) * inv_b
            diff = (h - mean) * row_mask
            var = jnp.sum(diff * diff, axis=0, keepdims=True) * inv_b
            scale = gb[0:1, :] * lax.rsqrt(var + BN_EPS)   # gamma folded in
            return jnp.maximum(diff * scale + gb[1:2, :], 0.0) * row_mask

        a = bn_relu(acc_ref[...], layer_refs[1][...])
        for l in range(1, n_layers):
            h = jnp.dot(a.astype(jnp.bfloat16), layer_refs[2 * l][...],
                        preferred_element_type=jnp.float32)
            a = bn_relu(h, layer_refs[2 * l + 1][...])
        o_ref[...] = a.astype(o_ref.dtype)


def fused_mlp(a_pad, flat_params, true_b):
    """Single-launch fused MLP.

    a_pad: (B_pad, K0) bf16, rows >= true_b are zero padding.
    flat_params: [w0, gb0, w1, gb1, ...]; w_l bf16 (Fin_l, Fout_l),
    gb_l f32 (2, Fout_l).  Returns (B_pad, Fout_last[_padded]) f32.
    """
    b_pad, k0 = a_pad.shape
    f1 = flat_params[0].shape[1]
    out_pad = flat_params[-2].shape[1]
    tk0 = _pick_k_tile(k0)
    n_k = k0 // tk0

    in_specs = [
        pl.BlockSpec((b_pad, tk0), lambda k: (0, k)),   # x: K-sliced
        pl.BlockSpec((tk0, f1), lambda k: (k, 0)),      # w0: K-sliced (pipelined)
    ]
    # Remaining (small) params: whole-array blocks, constant index -> DMA'd once.
    for arr in flat_params[1:]:
        in_specs.append(pl.BlockSpec(arr.shape, lambda k: (0, 0)))
    out_spec = pl.BlockSpec((b_pad, out_pad), lambda k: (0, 0))

    return pl.pallas_call(
        partial(_fused_mlp_kernel, true_b=true_b),
        out_shape=jax.ShapeDtypeStruct((b_pad, out_pad), jnp.float32),
        grid_spec=pltpu.PrefetchScalarGridSpec(
            num_scalar_prefetch=0,
            grid=(n_k,),
            in_specs=in_specs,
            out_specs=out_spec,
            scratch_shapes=[pltpu.VMEM((b_pad, f1), jnp.float32)],
        ),
        compiler_params=pltpu.CompilerParams(
            dimension_semantics=("arbitrary",)),  # K is a reduction axis
    )(a_pad, *flat_params)


def init_params(key, input_dim, hidden_dims, output_dim):
    """Parameter init mirroring the module's layer shapes.

    Folds the (all-ones, no-op) weight masks, the (out,in)->(in,out)
    transpose, the bf16 cast, and the lane-padding of the last layer into
    init, so the jitted forward does no per-call weight preprocessing.
    """
    dims = [input_dim] + list(hidden_dims) + [output_dim]
    n_layers = len(dims) - 1
    params = []
    for l in range(n_layers):
        fin, fout = dims[l], dims[l + 1]
        key, kw, kb = jax.random.split(key, 3)
        bound = 1.0 / math.sqrt(fin)
        # PyTorch Linear layout is (out, in); generated that way, folded below.
        w = jax.random.uniform(kw, (fout, fin), jnp.float32, -bound, bound)
        b = jax.random.uniform(kb, (fout,), jnp.float32, -bound, bound)
        gamma = jnp.ones((fout,), jnp.float32)    # BatchNorm1d default init
        beta = jnp.zeros((fout,), jnp.float32)
        mask_w = jnp.ones_like(w)                 # self.mask[...] = ones_like(p)

        # Fold mask (no-op), transpose, and bf16 cast at init.
        w_t = (w * mask_w).T.astype(jnp.bfloat16)        # (fin, fout)
        gb = jnp.stack([gamma, beta], axis=0)            # (2, fout)

        # Lane-pad the final layer's output features to a multiple of 128 so
        # the output store is lane-dense; padded columns yield exact zeros.
        if l == n_layers - 1 and fout % 128 != 0:
            fpad = ((fout + 127) // 128) * 128
            w_t = jnp.pad(w_t, ((0, 0), (0, fpad - fout)))
            gb = jnp.pad(gb, ((0, 0), (0, fpad - fout)))

        params.append(dict(
            w_t=w_t,   # bf16 (fin, fout[_padded]) -- fed to kernel
            gb=gb,     # f32  (2,   fout[_padded]) -- fed to kernel
            b=b,       # Linear bias: exactly cancelled by training-mode BN
                       # mean subtraction; kept for parameter-set fidelity.
        ))
    return params


@partial(jax.jit, static_argnames=("output_dim", "stage"))
def weight_masked_mlp_forward(x, params, output_dim, stage="fit"):
    """x: (B, C, W, H) NCHW, flattened exactly like x.view(B, -1).

    `stage` selects mask vs test_mask in the reference forward; the masks are
    all ones (and the rebinding there never mutates the params), so it has no
    computational effect and is accepted only for API fidelity.
    """
    B = x.shape[0]
    a = x.reshape(B, -1).astype(jnp.bfloat16)       # bf16 activations (half DMA)
    b_pad = ((B + 7) // 8) * 8
    if b_pad != B:
        a = jnp.pad(a, ((0, b_pad - B), (0, 0)))    # zero rows, masked in BN
    flat = []
    for layer in params:
        flat += [layer["w_t"], layer["gb"]]
    out = fused_mlp(a, flat, true_b=B)              # (B_pad, padded_out) f32
    return out[:B, :output_dim]


def _reference_forward(x, params, dims):
    """Pure-JAX reference at matching precision (bf16 matmul inputs, f32 BN)."""
    B = x.shape[0]
    a = x.reshape(B, -1).astype(jnp.float32)
    for l, layer in enumerate(params):
        fout = dims[l + 1]
        w = layer["w_t"][:, :fout]
        gamma = layer["gb"][0:1, :fout]
        beta = layer["gb"][1:2, :fout]
        h = jnp.dot(a.astype(jnp.bfloat16), w, preferred_element_type=jnp.float32)
        mean = jnp.mean(h, axis=0, keepdims=True)
        var = jnp.mean((h - mean) ** 2, axis=0, keepdims=True)
        h = (h - mean) * (gamma * lax.rsqrt(var + BN_EPS)) + beta
        a = jnp.maximum(h, 0.0)
    return a


if __name__ == "__main__":
    # Small shapes: B=2, C=4, spatial=16 -> input_dim = 4*16*16 = 1024
    B, C, W, H = 2, 4, 16, 16
    input_dim = C * W * H
    hidden_dims = [256, 128]
    output_dim = 64
    dims = [input_dim] + hidden_dims + [output_dim]

    key = jax.random.PRNGKey(0)
    kx, kp = jax.random.split(key)
    x = jax.random.normal(kx, (B, C, W, H), jnp.float32)
    params = init_params(kp, input_dim, hidden_dims, output_dim)

    out = weight_masked_mlp_forward(x, params, output_dim=output_dim, stage="fit")
    out = jax.block_until_ready(out)

    assert out.shape == (B, output_dim), out.shape
    assert bool(jnp.all(jnp.isfinite(out)))

    # Loose tolerance: with B=2, batch-norm can amplify rounding differences
    # on features whose two-sample spread is tiny; reference matches the
    # kernel's bf16 matmul inputs so only accumulation ordering differs.
    ref = _reference_forward(x, params, dims)[:, :output_dim]
    max_err = float(jnp.max(jnp.abs(out - ref)))
    assert max_err < 0.1, f"max abs err vs reference = {max_err}"

    print("KERNEL_OK")
</pallas_src>

<mosaic_0001>
module attributes {stable_mosaic.version = 11 : i64} {
  func.func @_fused_mlp_kernel(%arg0: i32, %arg1: memref<8x256xbf16, #tpu.memory_space<vmem>>, %arg2: memref<256x256xbf16, #tpu.memory_space<vmem>>, %arg3: memref<2x256xf32, #tpu.memory_space<vmem>>, %arg4: memref<256x128xbf16, #tpu.memory_space<vmem>>, %arg5: memref<2x128xf32, #tpu.memory_space<vmem>>, %arg6: memref<128x128xbf16, #tpu.memory_space<vmem>>, %arg7: memref<2x128xf32, #tpu.memory_space<vmem>>, %arg8: memref<8x128xf32, #tpu.memory_space<vmem>>, %arg9: memref<8x256xf32, #tpu.memory_space<vmem>>) attributes {dimension_semantics = [#tpu.dimension_semantics<arbitrary>], iteration_bounds = array<i64: 4>, scalar_prefetch = 0 : i64, scratch_operands = 1 : i64, tpu.core_type = #tpu.core_type<tc>, window_params = [{transform_indices = @transform_0, window_bounds = array<i64: 8, 256>}, {transform_indices = @transform_1, window_bounds = array<i64: 256, 256>}, {pipeline_mode = #tpu.pipeline_mode<synchronous>, transform_indices = @transform_2, window_bounds = array<i64: 2, 256>}, {pipeline_mode = #tpu.pipeline_mode<synchronous>, transform_indices = @transform_3, window_bounds = array<i64: 256, 128>}, {pipeline_mode = #tpu.pipeline_mode<synchronous>, transform_indices = @transform_4, window_bounds = array<i64: 2, 128>}, {pipeline_mode = #tpu.pipeline_mode<synchronous>, transform_indices = @transform_5, window_bounds = array<i64: 128, 128>}, {pipeline_mode = #tpu.pipeline_mode<synchronous>, transform_indices = @transform_6, window_bounds = array<i64: 2, 128>}, {pipeline_mode = #tpu.pipeline_mode<synchronous>, transform_indices = @transform_7, window_bounds = array<i64: 8, 128>}]} {
    %c0_i32 = arith.constant 0 : i32
    %0 = arith.cmpi eq, %arg0, %c0_i32 : i32
    %1 = arith.extui %0 : i1 to i32
    %c0_i32_0 = arith.constant 0 : i32
    %2 = arith.cmpi ne, %1, %c0_i32_0 : i32
    scf.if %2 {
      %cst_9 = arith.constant 0.000000e+00 : f32
      %12 = vector.broadcast %cst_9 : f32 to vector<8x256xf32>
      %c0_10 = arith.constant 0 : index
      %c0_11 = arith.constant 0 : index
      %13 = vector.load %arg9[%c0_10, %c0_11] : memref<8x256xf32, #tpu.memory_space<vmem>>, vector<8x256xf32>
      tpu.vector_store %arg9[%c0_10, %c0_11], %12 {strides = array<i32>} : memref<8x256xf32, #tpu.memory_space<vmem>>, vector<8x256xf32>,
    } else {
    }
    %c0 = arith.constant 0 : index
    %c0_1 = arith.constant 0 : index
    %3 = vector.load %arg9[%c0, %c0_1] : memref<8x256xf32, #tpu.memory_space<vmem>>, vector<8x256xf32>
    %c0_2 = arith.constant 0 : index
    %c0_3 = arith.constant 0 : index
    %4 = vector.load %arg1[%c0_2, %c0_3] : memref<8x256xbf16, #tpu.memory_space<vmem>>, vector<8x256xbf16>
    %c0_4 = arith.constant 0 : index
    %c0_5 = arith.constant 0 : index
    %5 = vector.load %arg2[%c0_4, %c0_5] : memref<256x256xbf16, #tpu.memory_space<vmem>>, vector<256x256xbf16>
    %cst = arith.constant dense<0.000000e+00> : vector<8x256xf32>
    %6 = tpu.matmul %4, %5, %cst {dimension_numbers = #tpu.dot_dimension_numbers<[1], [0], [0], [1], [0, 0, 1, 1], [], []>} : vector<8x256xbf16>, vector<256x256xbf16>, vector<8x256xf32> -> vector<8x256xf32>
    %7 = arith.addf %3, %6 : vector<8x256xf32>
    %c0_6 = arith.constant 0 : index
    %c0_7 = arith.constant 0 : index
    %8 = vector.load %arg9[%c0_6, %c0_7] : memref<8x256xf32, #tpu.memory_space<vmem>>, vector<8x256xf32>
    tpu.vector_store %arg9[%c0_6, %c0_7], %7 {strides = array<i32>} : memref<8x256xf32, #tpu.memory_space<vmem>>, vector<8x256xf32>,
    %c3_i32 = arith.constant 3 : i32
    %9 = arith.cmpi eq, %arg0, %c3_i32 : i32
    %10 = arith.extui %9 : i1 to i32
    %c0_i32_8 = arith.constant 0 : i32
    %11 = arith.cmpi ne, %10, %c0_i32_8 : i32
    scf.if %11 {
      %12 = tpu.iota {dimensions = array<i32: 0>} : vector<8x1xi32>
      %c2_i32 = arith.constant 2 : i32
      %13 = vector.broadcast %c2_i32 : i32 to vector<8x1xi32>
      %14 = arith.cmpi slt, %12, %13 : vector<8x1xi32>
      %15 = arith.extui %14 : vector<8x1xi1> to vector<8x1xi32>
      %16 = arith.sitofp %15 : vector<8x1xi32> to vector<8x1xf32>
      %c0_9 = arith.constant 0 : index
      %c0_10 = arith.constant 0 : index
      %17 = vector.load %arg9[%c0_9, %c0_10] : memref<8x256xf32, #tpu.memory_space<vmem>>, vector<8x256xf32>
      %c0_11 = arith.constant 0 : index
      %c0_12 = arith.constant 0 : index
      %18 = vector.load %arg3[%c0_11, %c0_12] : memref<2x256xf32, #tpu.memory_space<vmem>>, vector<2x256xf32>
      %cst_13 = arith.constant dense<0.000000e+00> : vector<256xf32>
      %19 = vector.multi_reduction <add>, %17, %cst_13 [0] : vector<8x256xf32> to vector<256xf32>
      %20 = vector.shape_cast %19 : vector<256xf32> to vector<1x256xf32>
      %cst_14 = arith.constant 5.000000e-01 : f32
      %21 = vector.broadcast %cst_14 : f32 to vector<1x256xf32>
      %22 = arith.mulf %20, %21 : vector<1x256xf32>
      %23 = vector.broadcast %22 : vector<1x256xf32> to vector<8x256xf32>
      %24 = arith.subf %17, %23 : vector<8x256xf32>
      %25 = vector.broadcast %16 : vector<8x1xf32> to vector<8x256xf32>
      %26 = arith.mulf %24, %25 : vector<8x256xf32>
      %27 = arith.mulf %26, %26 : vector<8x256xf32>
      %cst_15 = arith.constant dense<0.000000e+00> : vector<256xf32>
      %28 = vector.multi_reduction <add>, %27, %cst_15 [0] : vector<8x256xf32> to vector<256xf32>
      %29 = vector.shape_cast %28 : vector<256xf32> to vector<1x256xf32>
      %cst_16 = arith.constant 5.000000e-01 : f32
      %30 = vector.broadcast %cst_16 : f32 to vector<1x256xf32>
      %31 = arith.mulf %29, %30 : vector<1x256xf32>
      %32 = vector.extract_strided_slice %18 {offsets = [0, 0], sizes = [1, 256], strides = [1, 1]} : vector<2x256xf32> to vector<1x256xf32>
      %cst_17 = arith.constant 9.99999974E-6 : f32
      %33 = vector.broadcast %cst_17 : f32 to vector<1x256xf32>
      %34 = arith.addf %31, %33 : vector<1x256xf32>
      %35 = math.rsqrt %34 : vector<1x256xf32>
      %36 = arith.mulf %32, %35 : vector<1x256xf32>
      %37 = vector.broadcast %36 : vector<1x256xf32> to vector<8x256xf32>
      %38 = arith.mulf %26, %37 : vector<8x256xf32>
      %39 = vector.extract_strided_slice %18 {offsets = [1, 0], sizes = [1, 256], strides = [1, 1]} : vector<2x256xf32> to vector<1x256xf32>
      %40 = vector.broadcast %39 : vector<1x256xf32> to vector<8x256xf32>
      %41 = arith.addf %38, %40 : vector<8x256xf32>
      %cst_18 = arith.constant 0.000000e+00 : f32
      %42 = vector.broadcast %cst_18 : f32 to vector<8x256xf32>
      %43 = arith.maximumf %41, %42 : vector<8x256xf32>
      %44 = vector.broadcast %16 : vector<8x1xf32> to vector<8x256xf32>
      %45 = arith.mulf %43, %44 : vector<8x256xf32>
      %46 = arith.truncf %45 : vector<8x256xf32> to vector<8x256xbf16>
      %c0_19 = arith.constant 0 : index
      %c0_20 = arith.constant 0 : index
      %47 = vector.load %arg4[%c0_19, %c0_20] : memref<256x128xbf16, #tpu.memory_space<vmem>>, vector<256x128xbf16>
      %cst_21 = arith.constant dense<0.000000e+00> : vector<8x128xf32>
      %48 = tpu.matmul %46, %47, %cst_21 {dimension_numbers = #tpu.dot_dimension_numbers<[1], [0], [0], [1], [0, 0, 1, 1], [], []>} : vector<8x256xbf16>, vector<256x128xbf16>, vector<8x128xf32> -> vector<8x128xf32>
      %c0_22 = arith.constant 0 : index
      %c0_23 = arith.constant 0 : index
      %49 = vector.load %arg5[%c0_22, %c0_23] : memref<2x128xf32, #tpu.memory_space<vmem>>, vector<2x128xf32>
      %cst_24 = arith.constant dense<0.000000e+00> : vector<128xf32>
      %50 = vector.multi_reduction <add>, %48, %cst_24 [0] : vector<8x128xf32> to vector<128xf32>
      %51 = vector.shape_cast %50 : vector<128xf32> to vector<1x128xf32>
      %cst_25 = arith.constant 5.000000e-01 : f32
      %52 = vector.broadcast %cst_25 : f32 to vector<1x128xf32>
      %53 = arith.mulf %51, %52 : vector<1x128xf32>
      %54 = vector.broadcast %53 : vector<1x128xf32> to vector<8x128xf32>
      %55 = arith.subf %48, %54 : vector<8x128xf32>
      %56 = vector.broadcast %16 : vector<8x1xf32> to vector<8x128xf32>
      %57 = arith.mulf %55, %56 : vector<8x128xf32>
      %58 = arith.mulf %57, %57 : vector<8x128xf32>
      %cst_26 = arith.constant dense<0.000000e+00> : vector<128xf32>
      %59 = vector.multi_reduction <add>, %58, %cst_26 [0] : vector<8x128xf32> to vector<128xf32>
      %60 = vector.shape_cast %59 : vector<128xf32> to vector<1x128xf32>
      %cst_27 = arith.constant 5.000000e-01 : f32
      %61 = vector.broadcast %cst_27 : f32 to vector<1x128xf32>
      %62 = arith.mulf %60, %61 : vector<1x128xf32>
      %63 = vector.extract_strided_slice %49 {offsets = [0, 0], sizes = [1, 128], strides = [1, 1]} : vector<2x128xf32> to vector<1x128xf32>
      %cst_28 = arith.constant 9.99999974E-6 : f32
      %64 = vector.broadcast %cst_28 : f32 to vector<1x128xf32>
      %65 = arith.addf %62, %64 : vector<1x128xf32>
      %66 = math.rsqrt %65 : vector<1x128xf32>
      %67 = arith.mulf %63, %66 : vector<1x128xf32>
      %68 = vector.broadcast %67 : vector<1x128xf32> to vector<8x128xf32>
      %69 = arith.mulf %57, %68 : vector<8x128xf32>
      %70 = vector.extract_strided_slice %49 {offsets = [1, 0], sizes = [1, 128], strides = [1, 1]} : vector<2x128xf32> to vector<1x128xf32>
      %71 = vector.broadcast %70 : vector<1x128xf32> to vector<8x128xf32>
      %72 = arith.addf %69, %71 : vector<8x128xf32>
      %cst_29 = arith.constant 0.000000e+00 : f32
      %73 = vector.broadcast %cst_29 : f32 to vector<8x128xf32>
      %74 = arith.maximumf %72, %73 : vector<8x128xf32>
      %75 = vector.broadcast %16 : vector<8x1xf32> to vector<8x128xf32>
      %76 = arith.mulf %74, %75 : vector<8x128xf32>
      %77 = arith.truncf %76 : vector<8x128xf32> to vector<8x128xbf16>
      %c0_30 = arith.constant 0 : index
      %c0_31 = arith.constant 0 : index
      %78 = vector.load %arg6[%c0_30, %c0_31] : memref<128x128xbf16, #tpu.memory_space<vmem>>, vector<128x128xbf16>
      %cst_32 = arith.constant dense<0.000000e+00> : vector<8x128xf32>
      %79 = tpu.matmul %77, %78, %cst_32 {dimension_numbers = #tpu.dot_dimension_numbers<[1], [0], [0], [1], [0, 0, 1, 1], [], []>} : vector<8x128xbf16>, vector<128x128xbf16>, vector<8x128xf32> -> vector<8x128xf32>
      %c0_33 = arith.constant 0 : index
      %c0_34 = arith.constant 0 : index
      %80 = vector.load %arg7[%c0_33, %c0_34] : memref<2x128xf32, #tpu.memory_space<vmem>>, vector<2x128xf32>
      %cst_35 = arith.constant dense<0.000000e+00> : vector<128xf32>
      %81 = vector.multi_reduction <add>, %79, %cst_35 [0] : vector<8x128xf32> to vector<128xf32>
      %82 = vector.shape_cast %81 : vector<128xf32> to vector<1x128xf32>
      %cst_36 = arith.constant 5.000000e-01 : f32
      %83 = vector.broadcast %cst_36 : f32 to vector<1x128xf32>
      %84 = arith.mulf %82, %83 : vector<1x128xf32>
      %85 = vector.broadcast %84 : vector<1x128xf32> to vector<8x128xf32>
      %86 = arith.subf %79, %85 : vector<8x128xf32>
      %87 = vector.broadcast %16 : vector<8x1xf32> to vector<8x128xf32>
      %88 = arith.mulf %86, %87 : vector<8x128xf32>
      %89 = arith.mulf %88, %88 : vector<8x128xf32>
      %cst_37 = arith.constant dense<0.000000e+00> : vector<128xf32>
      %90 = vector.multi_reduction <add>, %89, %cst_37 [0] : vector<8x128xf32> to vector<128xf32>
      %91 = vector.shape_cast %90 : vector<128xf32> to vector<1x128xf32>
      %cst_38 = arith.constant 5.000000e-01 : f32
      %92 = vector.broadcast %cst_38 : f32 to vector<1x128xf32>
      %93 = arith.mulf %91, %92 : vector<1x128xf32>
      %94 = vector.extract_strided_slice %80 {offsets = [0, 0], sizes = [1, 128], strides = [1, 1]} : vector<2x128xf32> to vector<1x128xf32>
      %cst_39 = arith.constant 9.99999974E-6 : f32
      %95 = vector.broadcast %cst_39 : f32 to vector<1x128xf32>
      %96 = arith.addf %93, %95 : vector<1x128xf32>
      %97 = math.rsqrt %96 : vector<1x128xf32>
      %98 = arith.mulf %94, %97 : vector<1x128xf32>
      %99 = vector.broadcast %98 : vector<1x128xf32> to vector<8x128xf32>
      %100 = arith.mulf %88, %99 : vector<8x128xf32>
      %101 = vector.extract_strided_slice %80 {offsets = [1, 0], sizes = [1, 128], strides = [1, 1]} : vector<2x128xf32> to vector<1x128xf32>
      %102 = vector.broadcast %101 : vector<1x128xf32> to vector<8x128xf32>
      %103 = arith.addf %100, %102 : vector<8x128xf32>
      %cst_40 = arith.constant 0.000000e+00 : f32
      %104 = vector.broadcast %cst_40 : f32 to vector<8x128xf32>
      %105 = arith.maximumf %103, %104 : vector<8x128xf32>
      %106 = vector.broadcast %16 : vector<8x1xf32> to vector<8x128xf32>
      %107 = arith.mulf %105, %106 : vector<8x128xf32>
      %c0_41 = arith.constant 0 : index
      %c0_42 = arith.constant 0 : index
      %108 = vector.load %arg8[%c0_41, %c0_42] : memref<8x128xf32, #tpu.memory_space<vmem>>, vector<8x128xf32>
      tpu.vector_store %arg8[%c0_41, %c0_42], %107 {strides = array<i32>} : memref<8x128xf32, #tpu.memory_space<vmem>>, vector<8x128xf32>,
    } else {
    }
    return
  }
  func.func @transform_0(%arg0: i32) -> (i32, i32) {
    %c0_i32 = arith.constant 0 : i32
    %c0_i32_0 = arith.constant 0 : i32
    return %c0_i32, %arg0 : i32, i32
  }
  func.func @transform_1(%arg0: i32) -> (i32, i32) {
    %c0_i32 = arith.constant 0 : i32
    %c0_i32_0 = arith.constant 0 : i32
    return %arg0, %c0_i32 : i32, i32
  }
  func.func @transform_2(%arg0: i32) -> (i32, i32) {
    %c0_i32 = arith.constant 0 : i32
    %c0_i32_0 = arith.constant 0 : i32
    %c0_i32_1 = arith.constant 0 : i32
    return %c0_i32, %c0_i32_0 : i32, i32
  }
  func.func @transform_3(%arg0: i32) -> (i32, i32) {
    %c0_i32 = arith.constant 0 : i32
    %c0_i32_0 = arith.constant 0 : i32
    %c0_i32_1 = arith.constant 0 : i32
    return %c0_i32, %c0_i32_0 : i32, i32
  }
  func.func @transform_4(%arg0: i32) -> (i32, i32) {
    %c0_i32 = arith.constant 0 : i32
    %c0_i32_0 = arith.constant 0 : i32
    %c0_i32_1 = arith.constant 0 : i32
    return %c0_i32, %c0_i32_0 : i32, i32
  }
  func.func @transform_5(%arg0: i32) -> (i32, i32) {
    %c0_i32 = arith.constant 0 : i32
    %c0_i32_0 = arith.constant 0 : i32
    %c0_i32_1 = arith.constant 0 : i32
    return %c0_i32, %c0_i32_0 : i32, i32
  }
  func.func @transform_6(%arg0: i32) -> (i32, i32) {
    %c0_i32 = arith.constant 0 : i32
    %c0_i32_0 = arith.constant 0 : i32
    %c0_i32_1 = arith.constant 0 : i32
    return %c0_i32, %c0_i32_0 : i32, i32
  }
  func.func @transform_7(%arg0: i32) -> (i32, i32) {
    %c0_i32 = arith.constant 0 : i32
    %c0_i32_0 = arith.constant 0 : i32
    %c0_i32_1 = arith.constant 0 : i32
    return %c0_i32, %c0_i32_0 : i32, i32
  }
}

</mosaic_0001>

<bundles_post_ra>
// kernel: weight_masked_mlp_forward.1
= control target key start
LH: loop header
LB: loop body
LE: loop exit
PB: predicated region body
PF: predicated region fallthrough
CT: control target
= control target key end

     0   :  { %12 = vsyncpa [#allocation4], 0  ;;  %s1685_s0 = inlined_call_operand.vmem [shape: bf16[8,1024], index: 0, kind: input, shape index: {}]   ;;  %s1686_s1 = inlined_call_operand.hbm [shape: bf16[1024,256], index: 1, kind: input, shape index: {}]   ;;  %s1687_s2 = inlined_call_operand.vmem [shape: f32[2,256], index: 2, kind: input, shape index: {}]   ;;  %s1688_s3 = inlined_call_operand.vmem [shape: bf16[256,128], index: 3, kind: input, shape index: {}]   ;;  %s1689_s4 = inlined_call_operand.vmem [shape: f32[2,128], index: 4, kind: input, shape index: {}]   ;;  %s1690_s5 = inlined_call_operand.vmem [shape: bf16[128,128], index: 5, kind: input, shape index: {}]   ;;  %s1691_s6 = inlined_call_operand.vmem [shape: f32[2,128], index: 6, kind: input, shape index: {}]   ;;  %s1692_s7 = inlined_call_operand.vmem [shape: f32[8,128], index: 7, kind: output, shape index: {}]  }
   0x1   :  { %14 = vsyncpa [#allocation4 + $0x1], 0  ;;  %s1428_s24 = smov 0   ;;  %s1430_s25 = smov 0  }
   0x2   :  { %s1432_s26 = smov 0   ;;  %s1434_s27 = smov 0  }
   0x3 LB: > { %s1447_s28 = sadd.s32 4294967295, %s1379_s27   ;;  %s1450_s29 = sadd.s32 1, %s1379_s27   ;;  %s1379_s27 = sphi %s1434_s27, %s1701_s27   ;;  %s1375_s26 = sphi %s1432_s26, %s1700_s26   ;;  %s1371_s25 = sphi %s1430_s25, %s1699_s25   ;;  %s1367_s24 = sphi %s1428_s24, %s1698_s24  }
   0x4   : > { %s50_s30 = ssub.s32 %s1379_s27, %s1450_s29  ;;  %s53_s8 = sadd.s32 1, %s1375_s26 }
   0x5   : > { %p51_p0 = scmp.eq.s32.totalorder %s50_s30, 0  ;;  %p60_p1 = scmp.ne.s32.totalorder %s1375_s26, %s1371_s25 }
   0x6   : > { %p61_p2 = scmp.eq.s32.totalorder %s1379_s27, 0  ;;  %p66_p3 = scmp.ne.s32.totalorder %s1371_s25, %s1367_s24 }
   0x7   : > { %s1460_s9 = scalar_select %p51_p0, %s1375_s26, %s53_s8  }
   0x8   : > { %p62_p4 = por %p61_p2, %p60_p1  ;;  %p67_p5 = scmp.eq.s32.totalorder %s1447_s28, 0 }
   0x9   : > { %p1196_p6 = scmp.lt.s32.totalorder %s1379_s27, 4  ;;  %s240_s11 = sand.u32 1, %s1375_s26  }
   0xa   : > { %p1464_p7 = por %p67_p5, %p66_p3  ;;  %s1066_s12 = sshll.u32 %s240_s11, 8 }
   0xb   : > { %s1138_s13 = sshll.u32 %s1379_s27, 12  ;;  %s244_s17 = scalar_lea.vmem [#allocation3], %s1066_s12 }
   0xc   : > { %s1694_s10 = scalar_select %p1464_p7, 1, 0 }
   0xd   : > { %s1473_s16 = scalar_lea.hbm %s1686_s1, %s1138_s13  ;;  %s252_s18 = sshll.u32 %s244_s17, 4  ;;  %s1475_s18 = int_to_ptr.vmem [resolvable:$true] %s252_s18 }
   0xe   : > { %p1477_p8 = pnand %p1196_p6, %p62_p4  ;;  %s1482_s20 = scalar_lea.sflag [#allocation4], %s240_s11 }
   0xf   : > { %s1317_s21 = scalar_lea.hbm %s1473_s16, 4096  ;;  %s1322_s24 = scalar_lea.hbm %s1686_s1, 16384 }
  0x10   : > { %p1318_p10 = scmp.ne.s32.totalorder %s1473_s16, %s1317_s21  ;;  %p1319_p11 = pneg %p1477_p8 }
  0x11   : > { %p1323_p0 = scmp.lt.s32.totalorder %s1473_s16, %s1686_s1  ;;  %p1324_p1 = scmp.lt.s32.totalorder %s1322_s24, %s1317_s21 }
  0x12   : > { %p1320_p12 = pnand %p1319_p11, %p1318_p10 }
  0x13   : > { %p1325_p2 = por %p1324_p1, %p1323_p0 }
  0x14   : > { %p1321_p13 = pneg %p1320_p12 }
  0x16   : > { %p1326_p3 = pnand %p1325_p2, %p1321_p13 }
  0x18   : > { %1329 = shalt.err (!%p1326_p3)
}
  0x19   : > { %s1330_s11 = scalar_lea.vmem %s1475_s18, 4096  ;;  %s1381_s12 = smov [#allocation3]  }
  0x1a   : > { %p1331_p4 = scmp.ne.s32.totalorder %s1475_s18, %s1330_s11  ;;  %s1335_s13 = sshll.u32 %s1381_s12, 4  ;;  %s1336_s13 = int_to_ptr.vmem [resolvable:$false] %s1335_s13 }
  0x1b   : > { %s1337_s14 = scalar_lea.vmem %s1336_s13, 8192  ;;  %p1338_p10 = scmp.lt.s32.totalorder %s1475_s18, %s1336_s13 }
  0x1c   : > { %p1333_p5 = pnand %p1331_p4, %p1319_p11  ;;  %p1339_p12 = scmp.lt.s32.totalorder %s1337_s14, %s1330_s11 }
  0x1e   : > { %p1334_p6 = pneg %p1333_p5  ;;  %p1340_p9 = por %p1339_p12, %p1338_p10 }
  0x20   : > { %p1341_p7 = pnand %p1340_p9, %p1334_p6 }
  0x22   : > { %1344 = shalt.err (!%p1341_p7)
}
  0x23   : > { %s1382_s15 = smov 128   ;;  %s1383_s17 = smov 8  }
  0x24   : > { %1195 = dma.hbm_to_vmem [thread:$0]  (!%p1477_p8), %s1473_s16, 4096, %s1475_s18, %s1482_s20, %s1382_s15, %s1382_s15, %s1383_s17  }
  0x25   : > { %p260_p11 = scmp.lt.s32.totalorder %s1379_s27, 5  ;;  %p1696_p13 = scmp.ge.s32.totalorder %s1379_s27, 1 }
  0x27   : > { %p261_p0 = pnand %p1696_p13, %p260_p11 }
  0x28   : > { %s266_s21 = sand.u32 (!%p261_p0), 1, %s1371_s25   ;;  %p1697_p7 = scmp.ne.s32.totalorder (!%p261_p0), %s1694_s10, 0 }
  0x29   : > { %264 = sbr.rel (%p261_p0) target bundleno = 914 (0x392), region = 48  ;;  %s1071_s22 = sshll.u32 (!%p261_p0), %s266_s21, 8 }
  0x2a   : > { %s267_s23 = scalar_lea.sflag (!%p261_p0), [#allocation4], %s266_s21  ;;  %s1507_s24 = scalar_lea.vmem (!%p261_p0), [#allocation3], %s1071_s22 }
  0x2e   : > { %1362 = dma.done.wait (%p1697_p7), %s267_s23, 4096  }
  0x2f   : > { %1364 = vsyncadd (%p1697_p7), %s267_s23, 4294963200  ;;  %s1072_s30 = sshll.u32 %s1447_s28, 1  ;;  %p1074_p8 = scmp.ne.s32.totalorder %s1447_s28, 0 }
  0x30   : > { %p302_p9 = scmp.lt.s32.totalorder %s1072_s30, 7 }
  0x31   : > { %312 = sbr.rel (%p1074_p8) target bundleno = 56 (0x38), region = 56 }
  0x32   : > { %s1703_s30 = smov (!%p302_p9, %s1072_s30), 7 }
  0x33   : > { %s1073_s16 = sshll.u32 %s1703_s30, 2 }
  0x34   : > { %s1517_s19 = scalar_lea.vmem %s1685_s0, %s1073_s16 }
  0x36   : > { %v1384_v0 = vmov 0.0  }
  0x37   : > { %313 = vst [vmem:[#allocation2] sm:$0xff] %v1384_v0  ;;  %314 = vst [vmem:[#allocation2 + $0x8] sm:$0xff] %v1384_v0 }
  0x38 PF: > { %v1235_v1 = vld [vmem:[%s1507_s24 + $0x74] ss:$8 sps:$4 sm:$0xff]   ;;  %v1237_v2 = vld [vmem:[%s1507_s24 + $0x70] ss:$8 sps:$4 sm:$0xff]   ;;  %v1238_v3 = vld [vmem:[%s1507_s24 + $0x64] ss:$8 sps:$4 sm:$0xff]  }
  0x39   : > { %517 = vmatprep.subr.bf16.mxu0 %v1235_v1  ;;  %v1240_v4 = vld [vmem:[%s1507_s24 + $0x60] ss:$8 sps:$4 sm:$0xff]   ;;  %v1241_v5 = vld [vmem:[%s1507_s24 + $0x54] ss:$8 sps:$4 sm:$0xff]   ;;  %v1243_v6 = vld [vmem:[%s1507_s24 + $0x50] ss:$8 sps:$4 sm:$0xff]  }
  0x3a   : > { %518 = vmatpush1.bf16.msra.mxu0 %v1237_v2  ;;  %v1244_v7 = vld [vmem:[%s1507_s24 + $0x44] ss:$8 sps:$4 sm:$0xff]   ;;  %v1246_v8 = vld [vmem:[%s1507_s24 + $0x40] ss:$8 sps:$4 sm:$0xff]   ;;  %v1247_v9 = vld [vmem:[%s1507_s24 + $0x34] ss:$8 sps:$4 sm:$0xff]  }
  0x3b   : > { %519 = vmatprep.subr.bf16.mxu0 %v1238_v3  ;;  %v1249_v10 = vld [vmem:[%s1507_s24 + $0x30] ss:$8 sps:$4 sm:$0xff]   ;;  %v1250_v11 = vld [vmem:[%s1507_s24 + $0x24] ss:$8 sps:$4 sm:$0xff]   ;;  %v1252_v12 = vld [vmem:[%s1507_s24 + $0x20] ss:$8 sps:$4 sm:$0xff]  }
  0x3c   : > { %v1253_v13 = vld [vmem:[%s1507_s24 + $0x14] ss:$8 sps:$4 sm:$0xff]   ;;  %v1255_v16 = vld [vmem:[%s1507_s24 + $0x10] ss:$8 sps:$4 sm:$0xff]   ;;  %v1256_v17 = vld [vmem:[%s1507_s24 + $0x4] ss:$8 sps:$4 sm:$0xff]  }
  0x3d   : > { %v317_v14 = vld [vmem:[%s1517_s19] sm:$0xff]  ;;  %v1258_v18 = vld [vmem:[%s1507_s24] ss:$8 sps:$4 sm:$0xff]   ;;  %v1262_v21 = vld [vmem:[%s1507_s24 + $0xe4] ss:$8 sps:$4 sm:$0xff]   ;;  %p1109_p1 = scmp.ne.s32.totalorder %s1447_s28, 3 }
  0x3e   : > { %520 = vmatpush1.bf16.msra.mxu0 %v1240_v4  ;;  %v1076_v15 = vcombine.high %v317_v14, %v317_v14  ;;  %v1259_v19 = vld [vmem:[%s1507_s24 + $0xf4] ss:$8 sps:$4 sm:$0xff]   ;;  %v1261_v20 = vld [vmem:[%s1507_s24 + $0xf0] ss:$8 sps:$4 sm:$0xff]   ;;  %v1264_v22 = vld [vmem:[%s1507_s24 + $0xe0] ss:$8 sps:$4 sm:$0xff]   ;;  %v1075_v35 = vcombine.low %v317_v14, %v317_v14 }
  0x3f   : > { %521 = vmatprep.subr.bf16.mxu0 %v1241_v5  ;;  %v1265_v23 = vld [vmem:[%s1507_s24 + $0xd4] ss:$8 sps:$4 sm:$0xff]   ;;  %v1267_v24 = vld [vmem:[%s1507_s24 + $0xd0] ss:$8 sps:$4 sm:$0xff]   ;;  %v1268_v25 = vld [vmem:[%s1507_s24 + $0xc4] ss:$8 sps:$4 sm:$0xff]  }
  0x40   : > { %549 = vmatprep.mubr.bf16.mxu0 %v1076_v15  ;;  %v1270_v26 = vld [vmem:[%s1507_s24 + $0xc0] ss:$8 sps:$4 sm:$0xff]   ;;  %v1271_v27 = vld [vmem:[%s1507_s24 + $0xb4] ss:$8 sps:$4 sm:$0xff]   ;;  %v1273_v28 = vld [vmem:[%s1507_s24 + $0xb0] ss:$8 sps:$4 sm:$0xff]  }
  0x41   : > { %v1274_v29 = vld [vmem:[%s1507_s24 + $0xa4] ss:$8 sps:$4 sm:$0xff]   ;;  %v1276_v30 = vld [vmem:[%s1507_s24 + $0xa0] ss:$8 sps:$4 sm:$0xff]   ;;  %v1277_v31 = vld [vmem:[%s1507_s24 + $0x94] ss:$8 sps:$4 sm:$0xff]  }
  0x42   : > { %522 = vmatpush1.bf16.msra.mxu0 %v1243_v6  ;;  %v1279_v32 = vld [vmem:[%s1507_s24 + $0x90] ss:$8 sps:$4 sm:$0xff]   ;;  %v1280_v33 = vld [vmem:[%s1507_s24 + $0x84] ss:$8 sps:$4 sm:$0xff]   ;;  %v1282_v34 = vld [vmem:[%s1507_s24 + $0x80] ss:$8 sps:$4 sm:$0xff]  }
  0x43   : > { %523 = vmatprep.subr.bf16.mxu0 %v1244_v7  ;;  %v315_v36 = vld [vmem:[#allocation2] sm:$0xff]  ;;  %v316_v38 = vld [vmem:[#allocation2 + $0x8] sm:$0xff] }
  0x46   : > { %524 = vmatpush1.bf16.msra.mxu0 %v1246_v8 }
  0x47   : > { %525 = vmatprep.subr.bf16.mxu0 %v1247_v9 }
  0x4a   : > { %526 = vmatpush1.bf16.msra.mxu0 %v1249_v10 }
  0x4b   : > { %527 = vmatprep.subr.bf16.mxu0 %v1250_v11 }
  0x4e   : > { %528 = vmatpush1.bf16.msra.mxu0 %v1252_v12 }
  0x4f   : > { %529 = vmatprep.subr.bf16.mxu0 %v1253_v13 }
  0x52   : > { %530 = vmatpush1.bf16.msra.mxu0 %v1255_v16 }
  0x53   : > { %531 = vmatprep.subr.bf16.mxu0 %v1256_v17 }
  0x56   : > { %532 = vmatpush1.bf16.msra.mxu0 %v1258_v18 }
  0x57   : > { %533 = vmatprep.subr.bf16.mxu0 %v1259_v19 }
  0x5a   : > { %534 = vmatpush2.bf16.msra.mxu0 %v1261_v20 }
  0x5b   : > { %535 = vmatprep.subr.bf16.mxu0 %v1262_v21 }
  0x5e   : > { %536 = vmatpush2.bf16.msra.mxu0 %v1264_v22 }
  0x5f   : > { %537 = vmatprep.subr.bf16.mxu0 %v1265_v23 }
  0x62   : > { %538 = vmatpush2.bf16.msra.mxu0 %v1267_v24 }
  0x63   : > { %539 = vmatprep.subr.bf16.mxu0 %v1268_v25 }
  0x66   : > { %540 = vmatpush2.bf16.msra.mxu0 %v1270_v26 }
  0x67   : > { %541 = vmatprep.subr.bf16.mxu0 %v1271_v27 }
  0x6a   : > { %542 = vmatpush2.bf16.msra.mxu0 %v1273_v28 }
  0x6b   : > { %543 = vmatprep.subr.bf16.mxu0 %v1274_v29 }
  0x6e   : > { %544 = vmatpush2.bf16.msra.mxu0 %v1276_v30 }
  0x6f   : > { %545 = vmatprep.subr.bf16.mxu0 %v1277_v31 }
  0x72   : > { %546 = vmatpush2.bf16.msra.mxu0 %v1279_v32 }
  0x73   : > { %547 = vmatprep.subr.bf16.mxu0 %v1280_v33 }
  0x76   : > { %548 = vmatpush2.bf16.msra.mxu0 %v1282_v34 }
  0x79   : > { %550 = vmatmul.mubr.bf16.vlgmr.msra.gmra.mxu0 %v1075_v35 }
 0x139   : > { %v551_v37 = vpop.f32.mrf.mxu0 }
 0x13a   : > { %v558_v39 = vadd.f32 %v551_v37, %v315_v36 }
 0x13b   : > { %v553_v40 = vpop.f32.mrf.mxu0  ;;  %565 = sbr.rel (%p1109_p1) target bundleno = 914 (0x392), region = 60 }
 0x13c   : > { %560 = vst [vmem:[#allocation2] sm:$0xff] %v558_v39  ;;  %v559_v41 = vadd.f32 %v553_v40, %v316_v38 }
 0x13d   : > { %v555_v42 = vpop.f32.mrf.mxu0 }
 0x13e   : > { %561 = vst [vmem:[#allocation2 + $0x8] sm:$0xff] %v559_v41 }
 0x13f   : > { %v556_v43 = vpop.f32.mrf.mxu0 }
 0x140   : > { %v1285_v44 = vld [vmem:[%s1688_s3 + $0x78] sm:$0xff]   ;;  %v1385_v46 = vmov 0.0   ;;  %v1287_v47 = vld [vmem:[%s1688_s3 + $0x70] sm:$0xff]   ;;  %v1289_v49 = vld [vmem:[%s1688_s3 + $0x68] sm:$0xff]   ;;  %v566_v62 = vlaneseq  ;;  %v1386_v38 = vmov 1983009808  }
 0x141   : > { %v1286_v45 = vld [vmem:[%s1688_s3 + $0x38] sm:$0xff]   ;;  %1170 = vmatprep.subr.bf16.mxu1 %v1385_v46  ;;  %1139 = vmatprep.subr.bf16.mxu0 %v1285_v44  ;;  %v1288_v48 = vld [vmem:[%s1688_s3 + $0x30] sm:$0xff]   ;;  %v1290_v50 = vld [vmem:[%s1688_s3 + $0x28] sm:$0xff]   ;;  %v616_v39 = vunpack.c.l.s4 %v1386_v38  ;;  %vm1387_vm1 = vmmov 0  }
 0x142   : > { %1140 = vmatpush3.bf16.msra.mxu0 %v1286_v45  ;;  %v1291_v51 = vld [vmem:[%s1688_s3 + $0x60] sm:$0xff]   ;;  %v1293_v53 = vld [vmem:[%s1688_s3 + $0x58] sm:$0xff]   ;;  %v1295_v55 = vld [vmem:[%s1688_s3 + $0x50] sm:$0xff]   ;;  %v567_v4 = vshrl.u32 %v566_v62, 7  ;;  %1186 = vmatprep.mubr.msk.bf16.mxu1 %vm1387_vm1, %v1385_v46 }
 0x143   : > { %1141 = vmatprep.subr.bf16.mxu0 %v1287_v47  ;;  %v1292_v52 = vld [vmem:[%s1688_s3 + $0x20] sm:$0xff]   ;;  %v1294_v54 = vld [vmem:[%s1688_s3 + $0x18] sm:$0xff]   ;;  %v1296_v58 = vld [vmem:[%s1688_s3 + $0x10] sm:$0xff]   ;;  %v617_v40 = vunpack.c.0.s8 %v616_v39 }
 0x144   : > { %v571_v56 = vld [vmem:[#allocation2] sm:$0xff]  ;;  %v1297_v61 = vld [vmem:[%s1688_s3 + $0x48] sm:$0xff]   ;;  %vm568_vm0 = vcmp.lt.s32.totalorder %v567_v4, 2  ;;  %v1608_v45 = vsub.s32 1, %v567_v4  ;;  %v652_v47 = vsub.s32 3, %v567_v4 }
 0x145   : > { %v572_v57 = vld [vmem:[#allocation2 + $0x8] sm:$0xff]  ;;  %v574_v59 = vrot.slane %v571_v56, 4  ;;  %v1299_v7 = vld [vmem:[%s1688_s3 + $0x40] sm:$0xff]   ;;  %v1604_v15 = vsel %vm568_vm0, 1.0, %v1385_v46  ;;  %v620_v42 = vsub.s32 %v617_v40, %v567_v4 }
 0x146   : > { %1142 = vmatpush3.bf16.msra.mxu0 %v1288_v48  ;;  %v580_v60 = vrot.slane %v572_v57, 4  ;;  %v1298_v3 = vld [vmem:[%s1688_s3 + $0x8] sm:$0xff]   ;;  %v1300_v10 = vld [vmem:[%s1688_s3] sm:$0xff]  }
 0x147   : > { %1143 = vmatprep.subr.bf16.mxu0 %v1289_v49  ;;  %v575_v63 = vadd.f32 %v574_v59, %v571_v56  ;;  %v573_v48 = vld [vmem:[%s1687_s2] sm:$0xf] }
 0x148   : > { %v581_v0 = vadd.f32 %v580_v60, %v572_v57  ;;  %v840_v38 = vld [vmem:[%s1689_s4] sm:$0x3] }
 0x149   : > { %v576_v1 = vrot.slane %v575_v63, 2 }
 0x14a   : > { %1144 = vmatpush3.bf16.msra.mxu0 %v1290_v50  ;;  %v582_v2 = vrot.slane %v581_v0, 2  ;;  %v1613_v50 = vsub.s32 0, %v567_v4 }
 0x14b   : > { %1145 = vmatprep.subr.bf16.mxu0 %v1291_v51  ;;  %v577_v5 = vadd.f32 %v576_v1, %v575_v63  ;;  %v631_v51 = vsub.s32 2, %v567_v4 }
 0x14c   : > { %v583_v6 = vadd.f32 %v582_v2, %v581_v0 }
 0x14d   : > { %v578_v8 = vrot.slane %v577_v5, 1 }
 0x14e   : > { %1146 = vmatpush3.bf16.msra.mxu0 %v1292_v52  ;;  %v584_v9 = vrot.slane %v583_v6, 1 }
 0x14f   : > { %1147 = vmatprep.subr.bf16.mxu0 %v1293_v53  ;;  %v579_v11 = vadd.f32 %v578_v8, %v577_v5  ;;  %v653_v53 = vrot.slane %v573_v48, %v652_v47  ;;  %v1302_v8 = vld [vmem:[%s1690_s5 + $0x30] sm:$0xff]  }
 0x150   : > { %v585_v12 = vadd.f32 %v584_v9, %v583_v6  ;;  %v1303_v9 = vld [vmem:[%s1690_s5 + $0x28] sm:$0xff]  }
 0x151   : > { %v586_v13 = vmul.f32 0.5, %v579_v11  ;;  %v1305_v11 = vld [vmem:[%s1690_s5 + $0x18] sm:$0xff]  }
 0x152   : > { %1148 = vmatpush3.bf16.msra.mxu0 %v1294_v54  ;;  %v587_v14 = vmul.f32 0.5, %v585_v12  ;;  %v649_v54 = vrot.slane %v573_v48, %v1608_v45  ;;  %v1306_v12 = vld [vmem:[%s1690_s5 + $0x10] sm:$0xff]  }
 0x153   : > { %1149 = vmatprep.subr.bf16.mxu0 %v1295_v55  ;;  %v588_v16 = vsub.f32 %v571_v56, %v586_v13  ;;  %v1307_v13 = vld [vmem:[%s1690_s5 + $0x8] sm:$0xff]  }
 0x154   : > { %v589_v17 = vsub.f32 %v572_v57, %v587_v14  ;;  %v659_v60 = vrot.slane %v649_v54, %v1608_v45  ;;  %v1308_v14 = vld [vmem:[%s1690_s5] sm:$0xff]  }
 0x155   : > { %v590_v18 = vmul.f32 %v1604_v15, %v588_v16 }
 0x156   : > { %1150 = vmatpush3.bf16.msra.mxu0 %v1296_v58  ;;  %v591_v19 = vmul.f32 %v1604_v15, %v589_v17  ;;  %v663_v58 = vrot.slane %v653_v53, %v1608_v45 }
 0x157   : > { %1151 = vmatprep.subr.bf16.mxu0 %v1297_v61  ;;  %v592_v20 = vmul.f32 %v590_v18, %v590_v18 }
 0x158   : > { %v593_v21 = vmul.f32 %v591_v19, %v591_v19 }
 0x159   : > { %v594_v22 = vrot.slane %v592_v20, 4 }
 0x15a   : > { %1152 = vmatpush3.bf16.msra.mxu0 %v1298_v3  ;;  %v600_v23 = vrot.slane %v593_v21, 4 }
 0x15b   : > { %1153 = vmatprep.subr.bf16.mxu0 %v1299_v7  ;;  %v595_v24 = vadd.f32 %v594_v22, %v592_v20  ;;  %v1301_v7 = vld [vmem:[%s1690_s5 + $0x38] sm:$0xff]  }
 0x15c   : > { %v601_v25 = vadd.f32 %v600_v23, %v593_v21  ;;  %1171 = vmatpush3.bf16.msra.mxu1 %v1301_v7 }
 0x15d   : > { %v596_v26 = vrot.slane %v595_v24, 2  ;;  %1172 = vmatprep.subr.bf16.mxu1 %v1385_v46 }
 0x15e   : > { %1154 = vmatpush3.bf16.msra.mxu0 %v1300_v10  ;;  %v602_v27 = vrot.slane %v601_v25, 2  ;;  %v1304_v10 = vld [vmem:[%s1690_s5 + $0x20] sm:$0xff]  }
 0x15f   : > { %v597_v28 = vadd.f32 %v596_v26, %v595_v24 }
 0x160   : > { %v603_v29 = vadd.f32 %v602_v27, %v601_v25  ;;  %1173 = vmatpush3.bf16.msra.mxu1 %v1302_v8 }
 0x161   : > { %v598_v30 = vrot.slane %v597_v28, 1  ;;  %1174 = vmatprep.subr.bf16.mxu1 %v1385_v46 }
 0x162   : > { %v604_v31 = vrot.slane %v603_v29, 1 }
 0x163   : > { %v599_v32 = vadd.f32 %v598_v30, %v597_v28 }
 0x164   : > { %v605_v33 = vadd.f32 %v604_v31, %v603_v29  ;;  %1175 = vmatpush3.bf16.msra.mxu1 %v1303_v9  ;;  %v978_v9 = vld [vmem:[%s1691_s6] sm:$0x3] }
 0x165   : > { %v606_v34 = vmul.f32 0.5, %v599_v32  ;;  %1176 = vmatprep.subr.bf16.mxu1 %v1385_v46 }
 0x166   : > { %v607_v35 = vmul.f32 0.5, %v605_v33 }
 0x167   : > { %v608_v36 = vadd.f32 1e-05, %v606_v34 }
 0x168   : > { %v609_v37 = vadd.f32 1e-05, %v607_v35  ;;  %1177 = vmatpush3.bf16.msra.mxu1 %v1304_v10 }
 0x169   : > { %1309 = vrsqrt.f32 %v608_v36  ;;  %1178 = vmatprep.subr.bf16.mxu1 %v1385_v46 }
 0x16a   : > { %1311 = vrsqrt.f32 %v609_v37 }
 0x16c   : > { %1179 = vmatpush3.bf16.msra.mxu1 %v1305_v11 }
 0x16d   : > { %1180 = vmatprep.subr.bf16.mxu1 %v1385_v46 }
 0x170   : > { %1181 = vmatpush3.bf16.msra.mxu1 %v1306_v12 }
 0x171   : > { %1182 = vmatprep.subr.bf16.mxu1 %v1385_v46 }
 0x174   : > { %1183 = vmatpush3.bf16.msra.mxu1 %v1307_v13  ;;  %v1007_v13 = vrot.slane %v978_v9, %v1608_v45 }
 0x175   : > { %1184 = vmatprep.subr.bf16.mxu1 %v1385_v46 }
 0x176   : > { %v1310_v41 = vpop.eup %1309 }
 0x177   : > { %v1312_v43 = vpop.eup %1311 }
 0x178   : > { %v614_v44 = vcombine.low %v1310_v41, %v1312_v43  ;;  %1185 = vmatpush3.bf16.msra.mxu1 %v1308_v14 }
 0x17a   : > { %v621_v49 = vrot.slane %v614_v44, %v620_v42  ;;  %v869_v42 = vrot.slane %v840_v38, %v1608_v45 }
 0x17c   : > { %v623_v52 = vmul.f32 %v621_v49, %v573_v48 }
 0x17e   : > { %v632_v55 = vrot.slane %v623_v52, %v631_v51  ;;  %v628_v56 = vrot.slane %v623_v52, %v1613_v50 }
 0x180   : > { %v642_v57 = vrot.slane %v632_v55, %v1613_v50  ;;  %v638_v59 = vrot.slane %v628_v56, %v1613_v50 }
 0x182   : > { %v644_v61 = vmul.f32 %v642_v57, %v591_v19  ;;  %v643_v62 = vmul.f32 %v638_v59, %v590_v18 }
 0x184   : > { %v665_v63 = vadd.f32 %v663_v58, %v644_v61  ;;  %v664_v0 = vadd.f32 %v659_v60, %v643_v62 }
 0x186   : > { %v667_v1 = vmax.f32 %v665_v63, 0.0  ;;  %v666_v2 = vmax.f32 %v664_v0, 0.0 }
 0x188   : > { %v669_v3 = vmul.f32 %v1604_v15, %v667_v1  ;;  %v668_v4 = vmul.f32 %v1604_v15, %v666_v2 }
 0x18a   : > { %v671_v5 = vpack.c.bf16 %v669_v3, %v669_v3  ;;  %v670_v6 = vpack.c.bf16 %v668_v4, %v668_v4 }
 0x18c   : > { %832 = vmatprep.mubr.bf16.mxu0 %v671_v5 }
 0x18d   : > { %833 = vmatmul.mubr.bf16.vlgmr.msra.gmra.mxu0 %v670_v6 }
 0x24d   : > { %v1155_v16 = vpop.f32.mrf.mxu0 }
 0x24f   : > { %v1156_v17 = vpop.f32.mrf.mxu0 }
 0x250   : > { %v1157_v18 = vadd.f32 %v1156_v17, %v1155_v16 }
 0x251   : > { %v1158_v19 = vpop.f32.mrf.mxu0 }
 0x252   : > { %v841_v20 = vrot.slane %v1157_v18, 4 }
 0x253   : > { %v1159_v21 = vpop.f32.mrf.mxu0 }
 0x254   : > { %v842_v22 = vadd.f32 %v1157_v18, %v841_v20 }
 0x256   : > { %v843_v23 = vrot.slane %v842_v22, 2 }
 0x258   : > { %v844_v24 = vadd.f32 %v843_v23, %v842_v22 }
 0x25a   : > { %v845_v25 = vrot.slane %v844_v24, 1 }
 0x25c   : > { %v846_v26 = vadd.f32 %v845_v25, %v844_v24 }
 0x25e   : > { %v847_v27 = vmul.f32 0.5, %v846_v26 }
 0x260   : > { %v848_v28 = vsub.f32 %v1157_v18, %v847_v27 }
 0x262   : > { %v849_v29 = vmul.f32 %v1604_v15, %v848_v28 }
 0x264   : > { %v850_v30 = vmul.f32 %v849_v29, %v849_v29 }
 0x266   : > { %v851_v31 = vrot.slane %v850_v30, 4 }
 0x268   : > { %v852_v32 = vadd.f32 %v851_v31, %v850_v30 }
 0x26a   : > { %v853_v46 = vrot.slane %v852_v32, 2 }
 0x26c   : > { %v854_v33 = vadd.f32 %v853_v46, %v852_v32 }
 0x26e   : > { %v855_v34 = vrot.slane %v854_v33, 1 }
 0x270   : > { %v856_v35 = vadd.f32 %v855_v34, %v854_v33 }
 0x272   : > { %v857_v36 = vmul.f32 0.5, %v856_v35 }
 0x274   : > { %v858_v37 = vadd.f32 1e-05, %v857_v36 }
 0x276   : > { %1313 = vrsqrt.f32 %v858_v37 }
 0x283   : > { %v1314_v39 = vpop.eup %1313 }
 0x284   : > { %v860_v40 = vmul.f32 %v1314_v39, %v840_v38 }
 0x286   : > { %v864_v41 = vrot.slane %v860_v40, %v1613_v50 }
 0x288   : > { %v865_v43 = vmul.f32 %v864_v41, %v849_v29 }
 0x28a   : > { %v870_v44 = vadd.f32 %v869_v42, %v865_v43 }
 0x28c   : > { %v871_v47 = vmax.f32 %v870_v44, 0.0 }
 0x28e   : > { %v872_v48 = vmul.f32 %v1604_v15, %v871_v47 }
 0x290   : > { %v873_v49 = vpack.c.bf16 %v872_v48, %v872_v48 }
 0x292   : > { %1187 = vmatmul.mubr.bf16.vlgmr.msra.gmra.mxu1 %v873_v49 }
 0x352   : > { %v972_v51 = vpop.f32.mrf.mxu1 }
 0x353   : > { %v979_v52 = vrot.slane %v972_v51, 4 }
 0x354   : > { %v1188_v53 = vpop.f32.mrf.mxu1 }
 0x355   : > { %v980_v54 = vadd.f32 %v979_v52, %v972_v51 }
 0x356   : > { %v975_v55 = vpop.f32.mrf.mxu1 }
 0x357   : > { %v981_v56 = vrot.slane %v980_v54, 2 }
 0x358   : > { %v1189_v57 = vpop.f32.mrf.mxu1 }
 0x359   : > { %v982_v58 = vadd.f32 %v981_v56, %v980_v54 }
 0x35b   : > { %v983_v59 = vrot.slane %v982_v58, 1 }
 0x35d   : > { %v984_v60 = vadd.f32 %v983_v59, %v982_v58 }
 0x35f   : > { %v985_v61 = vmul.f32 0.5, %v984_v60 }
 0x361   : > { %v986_v62 = vsub.f32 %v972_v51, %v985_v61 }
 0x363   : > { %v987_v63 = vmul.f32 %v1604_v15, %v986_v62 }
 0x365   : > { %v988_v0 = vmul.f32 %v987_v63, %v987_v63 }
 0x367   : > { %v989_v1 = vrot.slane %v988_v0, 4 }
 0x369   : > { %v990_v2 = vadd.f32 %v989_v1, %v988_v0 }
 0x36b   : > { %v991_v3 = vrot.slane %v990_v2, 2 }
 0x36d   : > { %v992_v4 = vadd.f32 %v991_v3, %v990_v2 }
 0x36f   : > { %v993_v5 = vrot.slane %v992_v4, 1 }
 0x371   : > { %v994_v6 = vadd.f32 %v993_v5, %v992_v4 }
 0x373   : > { %v995_v7 = vmul.f32 0.5, %v994_v6 }
 0x375   : > { %v996_v8 = vadd.f32 1e-05, %v995_v7 }
 0x377   : > { %1315 = vrsqrt.f32 %v996_v8 }
 0x384   : > { %v1316_v10 = vpop.eup %1315 }
 0x385   : > { %v998_v11 = vmul.f32 %v1316_v10, %v978_v9 }
 0x387   : > { %v1002_v12 = vrot.slane %v998_v11, %v1613_v50 }
 0x389   : > { %v1003_v14 = vmul.f32 %v1002_v12, %v987_v63 }
 0x38b   : > { %v1008_v16 = vadd.f32 %v1007_v13, %v1003_v14 }
 0x38d   : > { %v1009_v17 = vmax.f32 %v1008_v16, 0.0 }
 0x38f   : > { %v1010_v18 = vmul.f32 %v1604_v15, %v1009_v17 }
 0x391   : > { %1011 = vst [vmem:[%s1692_s7] sm:$0xff] %v1010_v18 }
 0x392 PF: > { %p17_p2 = scmp.ge.s32.totalorder %s1450_s29, 6   ;;  %s1698_s24 = smov %s1371_s25 }
 0x393   : > { %s1699_s25 = smov %s1375_s26  ;;  %s1700_s26 = smov %s1460_s9 }
 0x394   : > { %s1701_s27 = smov %s1450_s29  ;;  %19 = sbr.rel (!%p17_p2) target bundleno = 3 (0x3), region = 95 }
 0x399   :  { %1023 = vsyncpa [#allocation4], 1 }
 0x39a   :  { %1025 = vsyncpa [#allocation4 + $0x1], 1 }

</bundles_post_ra>
